<compile_context>
chip_gen: v6e
topology: v6e:2x2x1
jax: 0.10.0
libtpu: 0.0.40
codegen_flags: <defaults>
</compile_context>

<pallas_src>
import functools

import jax
import jax.numpy as jnp
from jax.experimental import pallas as pl
from jax.experimental.pallas import tpu as pltpu

LANES = 128
_VMEM_LIMIT = 32 * 1024 * 1024   # comfortably under v7x's 64 MiB physical VMEM


# ----------------------------------------------------------------------------
# small helpers
# ----------------------------------------------------------------------------
def _round_up(n, m):
    return (n + m - 1) // m * m


def _pad_axis(a, axis, new_size):
    if a.shape[axis] == new_size:
        return a
    pad = [(0, 0)] * a.ndim
    pad[axis] = (0, new_size - a.shape[axis])
    return jnp.pad(a, pad)


def _cparams(sem):
    return pltpu.CompilerParams(dimension_semantics=sem,
                                vmem_limit_bytes=_VMEM_LIMIT)


def _bn_affine(partials, count, gamma, beta, eps):
    """partials: (..., 2, C) per-tile [sum, sumsq] -> (2, C) [scale, shift]."""
    sums = partials.reshape(-1, 2, partials.shape[-1]).sum(axis=0)
    mean = sums[0] / count
    var = jnp.maximum(sums[1] / count - mean * mean, 0.0)   # biased variance
    scale = gamma * jax.lax.rsqrt(var + eps)
    shift = beta - mean * scale
    return jnp.stack([scale, shift], axis=0).astype(jnp.float32)


# ----------------------------------------------------------------------------
# Pallas kernels
# ----------------------------------------------------------------------------
def _mm_stats_kernel(x_ref, w_ref, ps_ref):
    # y = x @ w (bf16 in, f32 acc); emit per-tile [sum, sumsq] over rows.
    y = jnp.dot(x_ref[...], w_ref[...], preferred_element_type=jnp.float32)
    s = jnp.sum(y, axis=0, keepdims=True)
    ss = jnp.sum(y * y, axis=0, keepdims=True)
    ps_ref[...] = jnp.concatenate([s, ss], axis=0)


def _mm_bn_act_kernel(x_ref, w_ref, aff_ref, o_ref, *, relu):
    y = jnp.dot(x_ref[...], w_ref[...], preferred_element_type=jnp.float32)
    y = y * aff_ref[0:1, :] + aff_ref[1:2, :]
    if relu:
        y = jnp.maximum(y, 0.0)
    o_ref[...] = y.astype(o_ref.dtype)


def _mm_bn_res_relu_kernel(x_ref, w_ref, aff_ref, r_ref, o_ref):
    y = jnp.dot(x_ref[...], w_ref[...], preferred_element_type=jnp.float32)
    y = y * aff_ref[0:1, :] + aff_ref[1:2, :]
    o_ref[...] = jnp.maximum(y + r_ref[...], 0.0).astype(o_ref.dtype)


def _conv3x3_rows(xt_ref, xm_ref, xb_ref, w_ref, W, cout):
    """3x3 conv (pad=1, stride=1) for one image row: 9 shifted matmuls."""
    acc = jnp.zeros((W, cout), jnp.float32)
    rows = (xt_ref, xm_ref, xb_ref)
    for dh in range(3):
        x = rows[dh][...]                       # (Wp, Cin) bf16
        for dw in range(3):
            acc = acc + jnp.dot(x[dw:dw + W, :], w_ref[dh * 3 + dw],
                                preferred_element_type=jnp.float32)
    return acc


def _conv3x3_stats_kernel(xt_ref, xm_ref, xb_ref, w_ref, ps_ref, *, W):
    y = _conv3x3_rows(xt_ref, xm_ref, xb_ref, w_ref, W, ps_ref.shape[-1])
    ps_ref[...] = jnp.concatenate(
        [jnp.sum(y, axis=0, keepdims=True), jnp.sum(y * y, axis=0, keepdims=True)],
        axis=0)


def _conv3x3_bn_relu_next_stats_kernel(xt_ref, xm_ref, xb_ref, w2_ref, aff2_ref,
                                       w3_ref, o_ref, ps3_ref, *, W):
    y = _conv3x3_rows(xt_ref, xm_ref, xb_ref, w2_ref, W, o_ref.shape[-1])
    y = jnp.maximum(y * aff2_ref[0:1, :] + aff2_ref[1:2, :], 0.0)
    t2 = y.astype(o_ref.dtype)                  # exactly what conv3 will consume
    o_ref[...] = t2
    v = jnp.dot(t2, w3_ref[...], preferred_element_type=jnp.float32)
    ps3_ref[...] = jnp.concatenate(
        [jnp.sum(v, axis=0, keepdims=True), jnp.sum(v * v, axis=0, keepdims=True)],
        axis=0)


# ----------------------------------------------------------------------------
# pallas_call builders
# ----------------------------------------------------------------------------
def matmul_stats(x_rows, w, tm):
    Mp, K = x_rows.shape
    _, N = w.shape
    T = Mp // tm
    ce = pl.CostEstimate(flops=2 * Mp * K * N, transcendentals=0,
                         bytes_accessed=Mp * K * 2 + K * N * 2 + T * 2 * N * 4)
    return pl.pallas_call(
        _mm_stats_kernel,
        grid=(T,),
        in_specs=[pl.BlockSpec((tm, K), lambda i: (i, 0)),
                  pl.BlockSpec((K, N), lambda i: (0, 0))],
        out_specs=pl.BlockSpec((None, 2, N), lambda i: (i, 0, 0)),
        out_shape=jax.ShapeDtypeStruct((T, 2, N), jnp.float32),
        compiler_params=_cparams(("parallel",)),
        cost_estimate=ce,
    )(x_rows, w)


def matmul_bn_act(x_rows, w, affine, tm, relu=True, out_dtype=jnp.bfloat16):
    Mp, K = x_rows.shape
    _, N = w.shape
    T = Mp // tm
    ce = pl.CostEstimate(flops=2 * Mp * K * N + 3 * Mp * N, transcendentals=0,
                         bytes_accessed=Mp * K * 2 + K * N * 2 + Mp * N * 2)
    return pl.pallas_call(
        functools.partial(_mm_bn_act_kernel, relu=relu),
        grid=(T,),
        in_specs=[pl.BlockSpec((tm, K), lambda i: (i, 0)),
                  pl.BlockSpec((K, N), lambda i: (0, 0)),
                  pl.BlockSpec((2, N), lambda i: (0, 0))],
        out_specs=pl.BlockSpec((tm, N), lambda i: (i, 0)),
        out_shape=jax.ShapeDtypeStruct((Mp, N), out_dtype),
        compiler_params=_cparams(("parallel",)),
        cost_estimate=ce,
    )(x_rows, w, affine)


def matmul_bn_residual_relu(x_rows, w, affine, res_rows, tm):
    Mp, K = x_rows.shape
    _, N = w.shape
    T = Mp // tm
    ce = pl.CostEstimate(flops=2 * Mp * K * N + 4 * Mp * N, transcendentals=0,
                         bytes_accessed=Mp * K * 2 + K * N * 2 + Mp * N * 4 + Mp * N * 4)
    return pl.pallas_call(
        _mm_bn_res_relu_kernel,
        grid=(T,),
        in_specs=[pl.BlockSpec((tm, K), lambda i: (i, 0)),
                  pl.BlockSpec((K, N), lambda i: (0, 0)),
                  pl.BlockSpec((2, N), lambda i: (0, 0)),
                  pl.BlockSpec((tm, N), lambda i: (i, 0))],
        out_specs=pl.BlockSpec((tm, N), lambda i: (i, 0)),
        out_shape=jax.ShapeDtypeStruct((Mp, N), jnp.float32),
        compiler_params=_cparams(("parallel",)),
        cost_estimate=ce,
    )(x_rows, w, affine, res_rows)


def conv3x3_stats(t1p, w2):
    Nb, Hp, Wp, Cin = t1p.shape
    H, W = Hp - 2, Wp - 2
    Cout = w2.shape[-1]
    ce = pl.CostEstimate(flops=2 * Nb * H * W * 9 * Cin * Cout, transcendentals=0,
                         bytes_accessed=3 * t1p.size * 2 + w2.size * 2 + Nb * H * 2 * Cout * 4)
    return pl.pallas_call(
        functools.partial(_conv3x3_stats_kernel, W=W),
        grid=(Nb, H),
        in_specs=[
            pl.BlockSpec((None, None, Wp, Cin), lambda n, h: (n, h, 0, 0)),
            pl.BlockSpec((None, None, Wp, Cin), lambda n, h: (n, h + 1, 0, 0)),
            pl.BlockSpec((None, None, Wp, Cin), lambda n, h: (n, h + 2, 0, 0)),
            pl.BlockSpec((9, Cin, Cout), lambda n, h: (0, 0, 0)),
        ],
        out_specs=pl.BlockSpec((None, None, 2, Cout), lambda n, h: (n, h, 0, 0)),
        out_shape=jax.ShapeDtypeStruct((Nb, H, 2, Cout), jnp.float32),
        compiler_params=_cparams(("parallel", "parallel")),
        cost_estimate=ce,
    )(t1p, t1p, t1p, w2)


def conv3x3_bn_relu_and_next_stats(t1p, w2, affine2, w3):
    Nb, Hp, Wp, Cin = t1p.shape
    H, W = Hp - 2, Wp - 2
    C2 = w2.shape[-1]
    C3 = w3.shape[-1]
    ce = pl.CostEstimate(
        flops=2 * Nb * H * W * (9 * Cin * C2 + C2 * C3) + 3 * Nb * H * W * C2,
        transcendentals=0,
        bytes_accessed=(3 * t1p.size * 2 + w2.size * 2 + w3.size * 2
                        + Nb * H * W * C2 * 2 + Nb * H * 2 * C3 * 4))
    return pl.pallas_call(
        functools.partial(_conv3x3_bn_relu_next_stats_kernel, W=W),
        grid=(Nb, H),
        in_specs=[
            pl.BlockSpec((None, None, Wp, Cin), lambda n, h: (n, h, 0, 0)),
            pl.BlockSpec((None, None, Wp, Cin), lambda n, h: (n, h + 1, 0, 0)),
            pl.BlockSpec((None, None, Wp, Cin), lambda n, h: (n, h + 2, 0, 0)),
            pl.BlockSpec((9, Cin, C2), lambda n, h: (0, 0, 0)),
            pl.BlockSpec((2, C2), lambda n, h: (0, 0)),
            pl.BlockSpec((C2, C3), lambda n, h: (0, 0)),
        ],
        out_specs=[
            pl.BlockSpec((None, None, W, C2), lambda n, h: (n, h, 0, 0)),
            pl.BlockSpec((None, None, 2, C3), lambda n, h: (n, h, 0, 0)),
        ],
        out_shape=(jax.ShapeDtypeStruct((Nb, H, W, C2), jnp.bfloat16),
                   jax.ShapeDtypeStruct((Nb, H, 2, C3), jnp.float32)),
        compiler_params=_cparams(("parallel", "parallel")),
        cost_estimate=ce,
    )(t1p, t1p, t1p, w2, affine2, w3)


# ----------------------------------------------------------------------------
# Bottleneck forward (stride=1, downsample=None -> identity residual)
# ----------------------------------------------------------------------------
def bottleneck_forward(x_nchw, params, stride=1, eps=1e-5):
    N, Cin, H, W = x_nchw.shape
    planes = params["w1"].shape[0]
    assert stride == 1 and Cin == 4 * planes, \
        "identity residual requires stride=1 and inplanes == planes*4"

    C0p = _round_up(Cin, LANES)          # conv1 input channels (== residual)
    C1p = _round_up(planes, LANES)       # conv1/conv2 output channels
    C3p = _round_up(4 * planes, LANES)   # conv3 output channels (== C0p)

    M = N * H * W
    tm = min(512, _round_up(M, 8))
    Mp = _round_up(M, tm)

    # ---- layout prep (boundary glue) ----------------------------------------
    x_nhwc = jnp.transpose(x_nchw, (0, 2, 3, 1)).astype(jnp.float32)
    x_rows_f32 = _pad_axis(_pad_axis(x_nhwc.reshape(M, Cin), 1, C0p), 0, Mp)
    x_rows_bf16 = x_rows_f32.astype(jnp.bfloat16)

    w1 = jnp.pad(params["w1"][:, :, 0, 0].T,
                 ((0, C0p - Cin), (0, C1p - planes))).astype(jnp.bfloat16)
    w2 = jnp.transpose(params["w2"], (2, 3, 1, 0)).reshape(9, planes, planes)
    w2 = jnp.pad(w2, ((0, 0), (0, C1p - planes), (0, C1p - planes))).astype(jnp.bfloat16)
    w3 = jnp.pad(params["w3"][:, :, 0, 0].T,
                 ((0, C1p - planes), (0, C3p - 4 * planes))).astype(jnp.bfloat16)

    g1 = _pad_axis(params["g1"].astype(jnp.float32), 0, C1p)
    b1 = _pad_axis(params["b1"].astype(jnp.float32), 0, C1p)
    g2 = _pad_axis(params["g2"].astype(jnp.float32), 0, C1p)
    b2 = _pad_axis(params["b2"].astype(jnp.float32), 0, C1p)
    g3 = _pad_axis(params["g3"].astype(jnp.float32), 0, C3p)
    b3 = _pad_axis(params["b3"].astype(jnp.float32), 0, C3p)

    # ---- conv1 (1x1) + bn1 + relu -------------------------------------------
    part1 = matmul_stats(x_rows_bf16, w1, tm)
    aff1 = _bn_affine(part1, M, g1, b1, eps)
    t1_rows = matmul_bn_act(x_rows_bf16, w1, aff1, tm, relu=True)   # (Mp, C1p) bf16

    # ---- conv2 (3x3, pad=1) without HBM im2col ------------------------------
    t1p = t1_rows[:M].reshape(N, H, W, C1p)
    t1p = jnp.pad(t1p, ((0, 0), (1, 1), (1, 1), (0, 0)))            # zero halo

    part2 = conv3x3_stats(t1p, w2)
    aff2 = _bn_affine(part2, M, g2, b2, eps)
    t2, part3 = conv3x3_bn_relu_and_next_stats(t1p, w2, aff2, w3)   # t2 bf16
    aff3 = _bn_affine(part3, M, g3, b3, eps)

    # ---- conv3 (1x1) + bn3 + residual + relu --------------------------------
    t2_rows = _pad_axis(t2.reshape(M, C1p), 0, Mp)
    out_rows = matmul_bn_residual_relu(t2_rows, w3, aff3, x_rows_f32, tm)
    out = out_rows[:M, :4 * planes].reshape(N, H, W, 4 * planes)
    return jnp.transpose(out, (0, 3, 1, 2))                         # back to NCHW


# ----------------------------------------------------------------------------
# Pure-JAX references (sanity checks only)
# ----------------------------------------------------------------------------
def reference_bottleneck(x, params, eps=1e-5, matmul_dtype=jnp.float32):
    def conv(y, w, stride=1, pad=0):
        return jax.lax.conv_general_dilated(
            y.astype(matmul_dtype), w.astype(matmul_dtype),
            (stride, stride), [(pad, pad), (pad, pad)],
            dimension_numbers=("NCHW", "OIHW", "NCHW"),
            preferred_element_type=jnp.float32)

    def bn(y, g, b):
        mean = jnp.mean(y, axis=(0, 2, 3), keepdims=True)
        var = jnp.mean(jnp.square(y - mean), axis=(0, 2, 3), keepdims=True)
        return (y - mean) * jax.lax.rsqrt(var + eps) * g.reshape(1, -1, 1, 1) \
            + b.reshape(1, -1, 1, 1)

    out = jax.nn.relu(bn(conv(x, params["w1"]), params["g1"], params["b1"]))
    out = jax.nn.relu(bn(conv(out, params["w2"], 1, 1), params["g2"], params["b2"]))
    out = bn(conv(out, params["w3"]), params["g3"], params["b3"])
    return jax.nn.relu(out + x)


if __name__ == "__main__":
    # Small shapes: batch=2, planes=4 (expansion 4 -> inplanes=out=16), 8x8 spatial.
    N, planes, H, W = 2, 4, 8, 8
    inplanes = planes * 4

    key = jax.random.PRNGKey(0)
    ks = jax.random.split(key, 10)
    params = {
        "w1": jax.random.normal(ks[0], (planes, inplanes, 1, 1), jnp.float32) * 0.2,
        "w2": jax.random.normal(ks[1], (planes, planes, 3, 3), jnp.float32) * 0.2,
        "w3": jax.random.normal(ks[2], (4 * planes, planes, 1, 1), jnp.float32) * 0.2,
        "g1": 1.0 + 0.1 * jax.random.normal(ks[3], (planes,), jnp.float32),
        "b1": 0.1 * jax.random.normal(ks[4], (planes,), jnp.float32),
        "g2": 1.0 + 0.1 * jax.random.normal(ks[5], (planes,), jnp.float32),
        "b2": 0.1 * jax.random.normal(ks[6], (planes,), jnp.float32),
        "g3": 1.0 + 0.1 * jax.random.normal(ks[7], (4 * planes,), jnp.float32),
        "b3": 0.1 * jax.random.normal(ks[8], (4 * planes,), jnp.float32),
    }
    x = jax.random.normal(ks[9], (N, inplanes, H, W), jnp.float32)

    out = jax.block_until_ready(bottleneck_forward(x, params, stride=1))
    assert out.shape == (N, inplanes, H, W)

    # Tight check vs a reference that also uses bf16 matmul inputs (validates
    # tiling / BN-stat / fusion structure), plus a loose sanity check vs f32.
    ref_bf16 = jax.block_until_ready(
        reference_bottleneck(x, params, matmul_dtype=jnp.bfloat16))
    ref_f32 = jax.block_until_ready(
        reference_bottleneck(x, params, matmul_dtype=jnp.float32))
    err_bf16 = float(jnp.max(jnp.abs(out - ref_bf16)))
    err_f32 = float(jnp.max(jnp.abs(out - ref_f32)))
    assert err_bf16 < 3e-2, f"mismatch vs bf16-matmul reference: {err_bf16}"
    assert err_f32 < 2.5e-1, f"mismatch vs f32 reference: {err_f32}"

    print("KERNEL_OK")
</pallas_src>

<mosaic_0001>
module attributes {stable_mosaic.version = 11 : i64} {
  func.func @_mm_stats_kernel(%arg0: i32, %arg1: memref<128x128xbf16, #tpu.memory_space<vmem>>, %arg2: memref<128x128xbf16, #tpu.memory_space<vmem>>, %arg3: memref<1x2x128xf32, #tpu.memory_space<vmem>>) attributes {dimension_semantics = [#tpu.dimension_semantics<parallel>], iteration_bounds = array<i64: 1>, scalar_prefetch = 0 : i64, scratch_operands = 0 : i64, tpu.core_type = #tpu.core_type<tc>, window_params = [{transform_indices = @transform_0, window_bounds = array<i64: 128, 128>}, {pipeline_mode = #tpu.pipeline_mode<synchronous>, transform_indices = @transform_1, window_bounds = array<i64: 128, 128>}, {transform_indices = @transform_2, window_bounds = array<i64: 1, 2, 128>}]} {
    %c0 = arith.constant 0 : index
    %c0_0 = arith.constant 0 : index
    %0 = vector.load %arg1[%c0, %c0_0] : memref<128x128xbf16, #tpu.memory_space<vmem>>, vector<128x128xbf16>
    %c0_1 = arith.constant 0 : index
    %c0_2 = arith.constant 0 : index
    %1 = vector.load %arg2[%c0_1, %c0_2] : memref<128x128xbf16, #tpu.memory_space<vmem>>, vector<128x128xbf16>
    %cst = arith.constant dense<0.000000e+00> : vector<128x128xf32>
    %2 = tpu.matmul %0, %1, %cst {dimension_numbers = #tpu.dot_dimension_numbers<[1], [0], [0], [1], [0, 0, 1, 1], [], []>} : vector<128x128xbf16>, vector<128x128xbf16>, vector<128x128xf32> -> vector<128x128xf32>
    %cst_3 = arith.constant dense<0.000000e+00> : vector<128xf32>
    %3 = vector.multi_reduction <add>, %2, %cst_3 [0] : vector<128x128xf32> to vector<128xf32>
    %4 = vector.shape_cast %3 : vector<128xf32> to vector<1x128xf32>
    %5 = arith.mulf %2, %2 : vector<128x128xf32>
    %cst_4 = arith.constant dense<0.000000e+00> : vector<128xf32>
    %6 = vector.multi_reduction <add>, %5, %cst_4 [0] : vector<128x128xf32> to vector<128xf32>
    %7 = vector.shape_cast %6 : vector<128xf32> to vector<1x128xf32>
    %8 = tpu.concatenate %4, %7 in 0 : vector<1x128xf32>, vector<1x128xf32> -> vector<2x128xf32>
    %c0_5 = arith.constant 0 : index
    %c0_6 = arith.constant 0 : index
    %c0_7 = arith.constant 0 : index
    %9 = vector.load %arg3[%c0_5, %c0_6, %c0_7] : memref<1x2x128xf32, #tpu.memory_space<vmem>>, vector<1x2x128xf32>
    %10 = vector.shape_cast %9 : vector<1x2x128xf32> to vector<2x128xf32>
    %11 = vector.shape_cast %8 : vector<2x128xf32> to vector<1x2x128xf32>
    tpu.vector_store %arg3[%c0_5, %c0_6, %c0_7], %11 {strides = array<i32>} : memref<1x2x128xf32, #tpu.memory_space<vmem>>, vector<1x2x128xf32>,
    return
  }
  func.func @transform_0(%arg0: i32) -> (i32, i32) {
    %c0_i32 = arith.constant 0 : i32
    %c0_i32_0 = arith.constant 0 : i32
    return %arg0, %c0_i32 : i32, i32
  }
  func.func @transform_1(%arg0: i32) -> (i32, i32) {
    %c0_i32 = arith.constant 0 : i32
    %c0_i32_0 = arith.constant 0 : i32
    %c0_i32_1 = arith.constant 0 : i32
    return %c0_i32, %c0_i32_0 : i32, i32
  }
  func.func @transform_2(%arg0: i32) -> (i32, i32, i32) {
    %c0_i32 = arith.constant 0 : i32
    %c0_i32_0 = arith.constant 0 : i32
    %c0_i32_1 = arith.constant 0 : i32
    return %arg0, %c0_i32, %c0_i32_0 : i32, i32, i32
  }
}

</mosaic_0001>

<bundles_post_ra>
// kernel: tpu_custom_call.1
= control target key start
LH: loop header
LB: loop body
LE: loop exit
PB: predicated region body
PF: predicated region fallthrough
CT: control target
= control target key end

     0   :  { %7 = vsyncpa [#allocation3], 0  ;;  %s539_s0 = inlined_call_operand.hbm [shape: bf16[128,128], index: 0, kind: input, shape index: {}]   ;;  %s540_s1 = inlined_call_operand.hbm [shape: bf16[128,128], index: 1, kind: input, shape index: {}]   ;;  %s541_s2 = inlined_call_operand.hbm [shape: f32[1,2,128], index: 2, kind: output, shape index: {}]  }
   0x1   :  { %8 = vsyncpa [#allocation6], 0 }
   0x2   :  { %9 = vsyncpa [#allocation4], 0  ;;  %s510_s9 = smov [#allocation2]  }
   0x3   :  { %s15_s10 = sshll.u32 %s510_s9, 4  ;;  %s16_s10 = int_to_ptr.vmem [resolvable:$true] %s15_s10 }
   0x4   :  { %s452_s11 = scalar_lea.vmem %s16_s10, 1024  ;;  %p457_p1 = scmp.lt.s32.totalorder %s16_s10, %s16_s10 }
   0x5   :  { %p453_p0 = scmp.ne.s32.totalorder %s16_s10, %s452_s11  ;;  %p458_p2 = scmp.lt.s32.totalorder %s452_s11, %s452_s11 }
   0x7   :  { %p459_p3 = por %p458_p2, %p457_p1 }
   0x9   :  { %p460_p4 = pnand %p459_p3, %p453_p0 }
   0xb   :  { %463 = shalt.err (!%p460_p4)
}
   0xc   :  { %s511_s12 = smov 64   ;;  %s512_s13 = smov 4  }
   0xd   :  { %21 = dma.hbm_to_vmem [thread:$0]  %s539_s0, 1024, %s16_s10, [#allocation3], %s511_s12, %s511_s12, %s512_s13  }
   0xe   :  { %s513_s16 = smov [#allocation5]  }
   0xf   :  { %s27_s17 = sshll.u32 %s513_s16, 4  ;;  %s28_s17 = int_to_ptr.vmem [resolvable:$true] %s27_s17 }
  0x10   :  { %s472_s18 = scalar_lea.vmem %s28_s17, 1024  ;;  %p477_p6 = scmp.lt.s32.totalorder %s28_s17, %s28_s17 }
  0x11   :  { %p473_p5 = scmp.ne.s32.totalorder %s28_s17, %s472_s18  ;;  %p478_p7 = scmp.lt.s32.totalorder %s472_s18, %s472_s18 }
  0x13   :  { %p479_p8 = por %p478_p7, %p477_p6 }
  0x15   :  { %p480_p9 = pnand %p479_p8, %p473_p5 }
  0x17   :  { %483 = shalt.err (!%p480_p9)
}
  0x18   :  { %33 = dma.hbm_to_vmem [thread:$0]  %s540_s1, 1024, %s28_s17, [#allocation6], %s511_s12, %s511_s12, %s512_s13  }
  0x19   :  { %504 = dma.done.wait [#allocation3], 1024  }
  0x1a   :  { %505 = vsyncadd [#allocation3], 4294966272 }
  0x1b   :  { %506 = dma.done.wait [#allocation6], 1024  }
  0x1c   :  { %507 = vsyncadd [#allocation6], 4294966272  ;;  %v428_v0 = vld [vmem:[#allocation5 + $0x38] sm:$0xff]   ;;  %v429_v1 = vld [vmem:[#allocation5 + $0x30] sm:$0xff]   ;;  %s514_s0 = smov [#allocation7]   ;;  %vm324_vm0 = vcmask 1040384  }
  0x1d   :  { %375 = vmatprep.subr.bf16.mxu0 %v428_v0  ;;  %407 = vmatprep.subr.bf16.mxu1 %v428_v0  ;;  %v430_v2 = vld [vmem:[#allocation5 + $0x28] sm:$0xff]   ;;  %v431_v3 = vld [vmem:[#allocation5 + $0x20] sm:$0xff]   ;;  %v432_v5 = vld [vmem:[#allocation5 + $0x18] sm:$0xff]   ;;  %s333_s1 = sshll.u32 %s514_s0, 4  ;;  %s334_s1 = int_to_ptr.vmem [resolvable:$true] %s333_s1 }
  0x1e   :  { %376 = vmatpush3.bf16.msra.mxu0 %v428_v0  ;;  %415 = vmatpush3.bf16.msra.mxu1 %v428_v0  ;;  %v436_v4 = vld [vmem:[#allocation2] sm:$0xff]   ;;  %v433_v7 = vld [vmem:[#allocation5 + $0x10] sm:$0xff]   ;;  %v434_v8 = vld [vmem:[#allocation5 + $0x8] sm:$0xff]   ;;  %s484_s21 = scalar_lea.vmem %s334_s1, 32  ;;  %p489_p11 = scmp.lt.s32.totalorder %s334_s1, %s334_s1 }
  0x1f   :  { %377 = vmatprep.subr.bf16.mxu0 %v429_v1  ;;  %408 = vmatprep.subr.bf16.mxu1 %v429_v1  ;;  %v440_v6 = vld [vmem:[#allocation2 + $0x20] sm:$0xff]   ;;  %v437_v10 = vld [vmem:[#allocation2 + $0x8] sm:$0xff]   ;;  %v438_v12 = vld [vmem:[#allocation2 + $0x10] sm:$0xff]   ;;  %p485_p10 = scmp.ne.s32.totalorder %s334_s1, %s484_s21  ;;  %p490_p12 = scmp.lt.s32.totalorder %s484_s21, %s484_s21 }
  0x20   :  { %391 = vmatprep.mubr.bf16.mxu0 %v436_v4  ;;  %399 = vmatprep.mubr.bf16.mxu1 %v440_v6  ;;  %v435_v9 = vld [vmem:[#allocation5] sm:$0xff]   ;;  %v441_v11 = vld [vmem:[#allocation2 + $0x28] sm:$0xff]   ;;  %v442_v13 = vld [vmem:[#allocation2 + $0x30] sm:$0xff]  }
  0x21   :  { %v439_v14 = vld [vmem:[#allocation2 + $0x18] sm:$0xff]   ;;  %p491_p13 = por %p490_p12, %p489_p11 }
  0x22   :  { %378 = vmatpush3.bf16.msra.mxu0 %v429_v1  ;;  %416 = vmatpush3.bf16.msra.mxu1 %v429_v1  ;;  %v443_v15 = vld [vmem:[#allocation2 + $0x38] sm:$0xff]  }
  0x23   :  { %379 = vmatprep.subr.bf16.mxu0 %v430_v2  ;;  %409 = vmatprep.subr.bf16.mxu1 %v430_v2  ;;  %p492_p0 = pnand %p491_p13, %p485_p10 }
  0x26   :  { %380 = vmatpush3.bf16.msra.mxu0 %v430_v2  ;;  %417 = vmatpush3.bf16.msra.mxu1 %v430_v2 }
  0x27   :  { %381 = vmatprep.subr.bf16.mxu0 %v431_v3  ;;  %410 = vmatprep.subr.bf16.mxu1 %v431_v3 }
  0x2a   :  { %382 = vmatpush3.bf16.msra.mxu0 %v431_v3  ;;  %418 = vmatpush3.bf16.msra.mxu1 %v431_v3 }
  0x2b   :  { %383 = vmatprep.subr.bf16.mxu0 %v432_v5  ;;  %411 = vmatprep.subr.bf16.mxu1 %v432_v5 }
  0x2e   :  { %384 = vmatpush3.bf16.msra.mxu0 %v432_v5  ;;  %419 = vmatpush3.bf16.msra.mxu1 %v432_v5 }
  0x2f   :  { %385 = vmatprep.subr.bf16.mxu0 %v433_v7  ;;  %412 = vmatprep.subr.bf16.mxu1 %v433_v7 }
  0x32   :  { %386 = vmatpush3.bf16.msra.mxu0 %v433_v7  ;;  %420 = vmatpush3.bf16.msra.mxu1 %v433_v7 }
  0x33   :  { %387 = vmatprep.subr.bf16.mxu0 %v434_v8  ;;  %413 = vmatprep.subr.bf16.mxu1 %v434_v8 }
  0x36   :  { %388 = vmatpush3.bf16.msra.mxu0 %v434_v8  ;;  %421 = vmatpush3.bf16.msra.mxu1 %v434_v8 }
  0x37   :  { %389 = vmatprep.subr.bf16.mxu0 %v435_v9  ;;  %414 = vmatprep.subr.bf16.mxu1 %v435_v9 }
  0x3a   :  { %390 = vmatpush3.bf16.msra.mxu0 %v435_v9  ;;  %422 = vmatpush3.bf16.msra.mxu1 %v435_v9 }
  0x3d   :  { %392 = vmatmul.mubr.bf16.vlgmr.msra.gmra.mxu0 %v437_v10  ;;  %400 = vmatmul.mubr.bf16.vlgmr.msra.gmra.mxu1 %v441_v11 }
  0x3e   :  { %395 = vmatprep.mubr.bf16.mxu0 %v438_v12  ;;  %403 = vmatprep.mubr.bf16.mxu1 %v442_v13 }
  0x45   :  { %396 = vmatmul.mubr.bf16.gmra.mxu0 %v439_v14  ;;  %404 = vmatmul.mubr.bf16.gmra.mxu1 %v443_v15 }
  0xfd   :  { %v393_v16 = vpop.f32.mrf.mxu0  ;;  %v401_v17 = vpop.f32.mrf.mxu1 }
  0xfe   :  { %v289_v27 = vmul.f32 %v393_v16, %v393_v16  ;;  %v297_v58 = vmul.f32 %v401_v17, %v401_v17 }
  0xff   :  { %v203_v18 = vpop.f32.mrf.mxu0  ;;  %v235_v20 = vpop.f32.mrf.mxu1 }
 0x100   :  { %v287_v22 = vmul.f32 %v203_v18, %v203_v18  ;;  %v295_v51 = vmul.f32 %v235_v20, %v235_v20 }
 0x101   :  { %v394_v19 = vpop.f32.mrf.mxu0  ;;  %v402_v26 = vpop.f32.mrf.mxu1 }
 0x102   :  { %v290_v31 = vmul.f32 %v394_v19, %v394_v19  ;;  %v298_v61 = vmul.f32 %v402_v26, %v402_v26 }
 0x103   :  { %v206_v21 = vpop.f32.mrf.mxu0  ;;  %v238_v35 = vpop.f32.mrf.mxu1 }
 0x104   :  { %v266_v23 = vadd.f32 %v206_v21, %v203_v18  ;;  %v288_v24 = vmul.f32 %v206_v21, %v206_v21  ;;  %v296_v55 = vmul.f32 %v238_v35, %v238_v35 }
 0x105   :  { %v397_v25 = vpop.f32.mrf.mxu0  ;;  %v405_v43 = vpop.f32.mrf.mxu1 }
 0x106   :  { %v267_v28 = vadd.f32 %v393_v16, %v266_v23  ;;  %v303_v29 = vadd.f32 %v288_v24, %v287_v22  ;;  %v293_v44 = vmul.f32 %v397_v25, %v397_v25  ;;  %v301_v7 = vmul.f32 %v405_v43, %v405_v43 }
 0x107   :  { %v219_v30 = vpop.f32.mrf.mxu0  ;;  %v251_v50 = vpop.f32.mrf.mxu1 }
 0x108   :  { %v304_v32 = vadd.f32 %v303_v29, %v289_v27  ;;  %v268_v33 = vadd.f32 %v394_v19, %v267_v28  ;;  %v291_v37 = vmul.f32 %v219_v30, %v219_v30  ;;  %v299_v2 = vmul.f32 %v251_v50, %v251_v50 }
 0x109   :  { %v398_v34 = vpop.f32.mrf.mxu0  ;;  %v406_v57 = vpop.f32.mrf.mxu1 }
 0x10a   :  { %v269_v36 = vadd.f32 %v268_v33, %v219_v30  ;;  %v305_v38 = vadd.f32 %v304_v32, %v290_v31  ;;  %v294_v47 = vmul.f32 %v398_v34, %v398_v34  ;;  %v302_v10 = vmul.f32 %v406_v57, %v406_v57 }
 0x10b   :  { %v222_v39 = vpop.f32.mrf.mxu0  ;;  %v254_v0 = vpop.f32.mrf.mxu1 }
 0x10c   :  { %v306_v40 = vadd.f32 %v305_v38, %v291_v37  ;;  %v270_v41 = vadd.f32 %v269_v36, %v222_v39  ;;  %v292_v42 = vmul.f32 %v222_v39, %v222_v39  ;;  %v300_v6 = vmul.f32 %v254_v0, %v254_v0 }
 0x10e   :  { %v271_v45 = vadd.f32 %v397_v25, %v270_v41  ;;  %v307_v46 = vadd.f32 %v306_v40, %v292_v42 }
 0x110   :  { %v272_v48 = vadd.f32 %v398_v34, %v271_v45  ;;  %v308_v49 = vadd.f32 %v307_v46, %v293_v44 }
 0x112   :  { %v309_v52 = vadd.f32 %v308_v49, %v294_v47  ;;  %v273_v53 = vadd.f32 %v272_v48, %v235_v20 }
 0x114   :  { %v274_v54 = vadd.f32 %v273_v53, %v238_v35  ;;  %v310_v56 = vadd.f32 %v309_v52, %v295_v51 }
 0x116   :  { %v275_v59 = vadd.f32 %v401_v17, %v274_v54  ;;  %v311_v60 = vadd.f32 %v310_v56, %v296_v55 }
 0x118   :  { %v312_v62 = vadd.f32 %v311_v60, %v297_v58  ;;  %v276_v63 = vadd.f32 %v402_v26, %v275_v59 }
 0x11a   :  { %v277_v1 = vadd.f32 %v276_v63, %v251_v50  ;;  %v313_v3 = vadd.f32 %v312_v62, %v298_v61 }
 0x11c   :  { %v314_v4 = vadd.f32 %v313_v3, %v299_v2  ;;  %v278_v5 = vadd.f32 %v277_v1, %v254_v0 }
 0x11e   :  { %v279_v8 = vadd.f32 %v405_v43, %v278_v5  ;;  %v315_v9 = vadd.f32 %v314_v4, %v300_v6 }
 0x120   :  { %v280_v11 = vadd.f32 %v406_v57, %v279_v8  ;;  %v316_v12 = vadd.f32 %v315_v9, %v301_v7 }
 0x122   :  { %v281_v13 = vrot.slane %v280_v11, 4  ;;  %v317_v14 = vadd.f32 %v316_v12, %v302_v10 }
 0x124   :  { %v282_v15 = vadd.f32 %v281_v13, %v280_v11  ;;  %v318_v16 = vrot.slane %v317_v14, 4 }
 0x126   :  { %v283_v17 = vrot.slane %v282_v15, 2  ;;  %v319_v18 = vadd.f32 %v318_v16, %v317_v14 }
 0x128   :  { %v284_v19 = vadd.f32 %v283_v17, %v282_v15  ;;  %v320_v20 = vrot.slane %v319_v18, 2 }
 0x12a   :  { %v285_v21 = vrot.slane %v284_v19, 1  ;;  %v321_v22 = vadd.f32 %v320_v20, %v319_v18 }
 0x12c   :  { %v322_v23 = vrot.slane %v321_v22, 1  ;;  %v286_v24 = vadd.f32 %v285_v21, %v284_v19 }
 0x12e   :  { %v323_v25 = vadd.f32 %v322_v23, %v321_v22 }
 0x130   :  { %v325_v26 = vsel %vm324_vm0, %v286_v24, %v323_v25 }
 0x131   :  { %326 = vst [vmem:[#allocation7] sm:$0x3] %v325_v26 }
 0x132   :  { %495 = shalt.err (!%p492_p0)
}
 0x133   :  { %336 = dma.vmem_to_hbm [thread:$0]  %s334_s1, 32, %s541_s2, [#allocation4]  }
 0x134   :  { %508 = dma.done.wait [#allocation4], 32  }
 0x135   :  { %509 = vsyncadd [#allocation4], 4294967264 }
 0x136   :  { %340 = vsyncpa [#allocation3], 1 }
 0x137   :  { %341 = vsyncpa [#allocation6], 1 }
 0x138   :  { %342 = vsyncpa [#allocation4], 1 }

</bundles_post_ra>
